<compile_context>
chip_gen: v5e
topology: v5e:2x2
jax: 0.10.0
libtpu: 0.0.40
codegen_flags: <defaults>
</compile_context>

<pallas_src>
import functools

import jax
import jax.numpy as jnp
from jax.experimental import pallas as pl
from jax.experimental.pallas import tpu as pltpu


def se_attention_kernel(x_ref, w1t_ref, b1_ref, w2t_ref, b2_ref, o_ref, *,
                        inv_hw):
    # x_ref : (Nb, C, HWp)  slab of images; channels on sublanes, pixels lanes
    # w1t_ref: (C, Cr)      squeeze 1x1-conv weight, pre-transposed (f32)
    # b1_ref : (1, Cr)
    # w2t_ref: (Cr, C)      excite 1x1-conv weight, pre-transposed (f32)
    # b2_ref : (1, C)
    # o_ref  : (Nb, C, HWp)
    xf = x_ref[...].astype(jnp.float32)                     # f32 math in-VMEM

    # ---- AdaptiveAvgPool2d(1): mean over pixels (pad columns are zero) ----
    pool = jnp.sum(xf, axis=2) * inv_hw                     # (Nb, C)

    # ---- fc: Conv2d(C,C//8,1) -> ReLU -> Conv2d(C//8,C,1) -> Sigmoid ------
    h = jnp.dot(pool, w1t_ref[...],
                preferred_element_type=jnp.float32) + b1_ref[...]   # (Nb, Cr)
    h = jnp.maximum(h, 0.0)
    s = jnp.dot(h, w2t_ref[...],
                preferred_element_type=jnp.float32) + b2_ref[...]   # (Nb, C)
    s = jax.nn.sigmoid(s)

    # ---- channel-wise rescale, broadcast (Nb, C, 1) along lanes -----------
    o_ref[...] = (xf * s[:, :, None]).astype(o_ref.dtype)


def attention_block(x_nchw, w1, b1, w2, b2, *, target_slab_bytes=2 << 20):
    """x_nchw: (N, C, H, W); w1: (C//8, C, 1, 1); b1: (C//8,);
    w2: (C, C//8, 1, 1); b2: (C,)  (PyTorch layouts)."""
    N, C, H, W = x_nchw.shape
    Cr = w1.shape[0]
    HW = H * W

    # --- keep the lane dim dense: pad pixels to a multiple of 128 ----------
    HWp = ((HW + 127) // 128) * 128
    x3 = x_nchw.reshape(N, C, HW)
    if HWp != HW:
        x3 = jnp.pad(x3, ((0, 0), (0, 0), (0, HWp - HW)))

    # --- choose images per grid step (multi-MiB slabs, VMEM-safe) ----------
    itemsize = jnp.dtype(x_nchw.dtype).itemsize
    per_img = C * HWp * itemsize
    max_slab = 3 << 20                       # 4x slab stays < 16 MiB (v5e)
    nb = max(1, min(target_slab_bytes, max_slab) // per_img)
    nb = int(min(nb, N))
    if N >= 2:
        nb = min(nb, pl.cdiv(N, 2))          # >=2 steps -> both v7x TCs work
    nb = max(1, nb)

    # --- pad batch so blocks divide evenly (padded rows are independent) ---
    n_steps = pl.cdiv(N, nb)
    Np = n_steps * nb
    if Np != N:
        x3 = jnp.pad(x3, ((0, Np - N), (0, 0), (0, 0)))

    # --- tiny weights: pre-transpose once, keep resident in VMEM -----------
    w1t = w1.reshape(Cr, C).T.astype(jnp.float32)            # (C, Cr)
    w2t = w2.reshape(C, Cr).T.astype(jnp.float32)            # (Cr, C)
    b1r = b1.reshape(1, Cr).astype(jnp.float32)
    b2r = b2.reshape(1, C).astype(jnp.float32)

    kernel = functools.partial(se_attention_kernel, inv_hw=1.0 / HW)

    out3 = pl.pallas_call(
        kernel,
        out_shape=jax.ShapeDtypeStruct((Np, C, HWp), x_nchw.dtype),
        grid=(n_steps,),
        in_specs=[
            pl.BlockSpec((nb, C, HWp), lambda n: (n, 0, 0)),   # image slab
            pl.BlockSpec((C, Cr), lambda n: (0, 0)),           # resident wts
            pl.BlockSpec((1, Cr), lambda n: (0, 0)),
            pl.BlockSpec((Cr, C), lambda n: (0, 0)),
            pl.BlockSpec((1, C), lambda n: (0, 0)),
        ],
        out_specs=pl.BlockSpec((nb, C, HWp), lambda n: (n, 0, 0)),
        compiler_params=pltpu.CompilerParams(
            dimension_semantics=("parallel",)),
    )(x3, w1t, b1r, w2t, b2r)

    return out3[:N, :, :HW].reshape(N, C, H, W)


def attention_block_ref(x, w1, b1, w2, b2):
    """Pure-JAX reference mirroring the PyTorch AttentionBlock forward."""
    N, C, H, W = x.shape
    xf = x.astype(jnp.float32)
    pool = jnp.mean(xf, axis=(2, 3))                               # (N, C)
    h = jnp.maximum(pool @ w1.reshape(-1, C).T + b1, 0.0)          # (N, C//8)
    s = jax.nn.sigmoid(h @ w2.reshape(C, -1).T + b2)               # (N, C)
    return (xf * s[:, :, None, None]).astype(x.dtype)


if __name__ == "__main__":
    key = jax.random.PRNGKey(0)

    # ---------------- primary test: f32, HW multiple of 128 ----------------
    N, C, H, W = 8, 32, 16, 16
    Cr = C // 8
    kx, k1, k2, k3, k4, k5 = jax.random.split(key, 6)
    x = jax.random.normal(kx, (N, C, H, W), dtype=jnp.float32)
    w1 = jax.random.normal(k1, (Cr, C, 1, 1), dtype=jnp.float32) * 0.1
    b1 = jax.random.normal(k2, (Cr,), dtype=jnp.float32) * 0.1
    w2 = jax.random.normal(k3, (C, Cr, 1, 1), dtype=jnp.float32) * 0.1
    b2 = jax.random.normal(k4, (C,), dtype=jnp.float32) * 0.1

    out = attention_block(x, w1, b1, w2, b2)
    jax.block_until_ready(out)
    ref = attention_block_ref(x, w1, b1, w2, b2)
    assert out.shape == (N, C, H, W)
    assert jnp.allclose(out, ref, rtol=1e-4, atol=1e-4)

    # ------------- bf16 HBM I/O (halved traffic), f32 internal math --------
    xb = x.astype(jnp.bfloat16)
    out_b = attention_block(xb, w1, b1, w2, b2)
    jax.block_until_ready(out_b)
    ref_b = attention_block_ref(xb, w1, b1, w2, b2)
    assert out_b.dtype == jnp.bfloat16
    assert jnp.allclose(out_b.astype(jnp.float32), ref_b.astype(jnp.float32),
                        rtol=5e-2, atol=5e-2)

    # ------------- non-128-multiple HW exercises the lane-pad path ---------
    N2, C2, H2, W2 = 4, 16, 7, 7
    Cr2 = C2 // 8
    x2 = jax.random.normal(k5, (N2, C2, H2, W2), dtype=jnp.float32)
    w1s = jax.random.normal(k1, (Cr2, C2, 1, 1), dtype=jnp.float32) * 0.1
    b1s = jax.random.normal(k2, (Cr2,), dtype=jnp.float32) * 0.1
    w2s = jax.random.normal(k3, (C2, Cr2, 1, 1), dtype=jnp.float32) * 0.1
    b2s = jax.random.normal(k4, (C2,), dtype=jnp.float32) * 0.1
    out2 = attention_block(x2, w1s, b1s, w2s, b2s)
    jax.block_until_ready(out2)
    ref2 = attention_block_ref(x2, w1s, b1s, w2s, b2s)
    assert out2.shape == (N2, C2, H2, W2)
    assert jnp.allclose(out2, ref2, rtol=1e-4, atol=1e-4)

    print("KERNEL_OK")
</pallas_src>

<mosaic_0001>
module attributes {stable_mosaic.version = 11 : i64} {
  func.func @se_attention_kernel(%arg0: i32, %arg1: memref<4x32x256xf32, #tpu.memory_space<vmem>>, %arg2: memref<32x4xf32, #tpu.memory_space<vmem>>, %arg3: memref<1x4xf32, #tpu.memory_space<vmem>>, %arg4: memref<4x32xf32, #tpu.memory_space<vmem>>, %arg5: memref<1x32xf32, #tpu.memory_space<vmem>>, %arg6: memref<4x32x256xf32, #tpu.memory_space<vmem>>) attributes {dimension_semantics = [#tpu.dimension_semantics<parallel>], iteration_bounds = array<i64: 2>, scalar_prefetch = 0 : i64, scratch_operands = 0 : i64, tpu.core_type = #tpu.core_type<tc>, window_params = [{transform_indices = @transform_0, window_bounds = array<i64: 4, 32, 256>}, {pipeline_mode = #tpu.pipeline_mode<synchronous>, transform_indices = @transform_1, window_bounds = array<i64: 32, 4>}, {pipeline_mode = #tpu.pipeline_mode<synchronous>, transform_indices = @transform_2, window_bounds = array<i64: 1, 4>}, {pipeline_mode = #tpu.pipeline_mode<synchronous>, transform_indices = @transform_3, window_bounds = array<i64: 4, 32>}, {pipeline_mode = #tpu.pipeline_mode<synchronous>, transform_indices = @transform_4, window_bounds = array<i64: 1, 32>}, {transform_indices = @transform_5, window_bounds = array<i64: 4, 32, 256>}]} {
    %c0 = arith.constant 0 : index
    %c0_0 = arith.constant 0 : index
    %c0_1 = arith.constant 0 : index
    %0 = vector.load %arg1[%c0, %c0_0, %c0_1] : memref<4x32x256xf32, #tpu.memory_space<vmem>>, vector<4x32x256xf32>
    %cst = arith.constant dense<0.000000e+00> : vector<4x32xf32>
    %1 = vector.multi_reduction <add>, %0, %cst [2] : vector<4x32x256xf32> to vector<4x32xf32>
    %cst_2 = arith.constant 3.906250e-03 : f32
    %2 = vector.broadcast %cst_2 : f32 to vector<4x32xf32>
    %3 = arith.mulf %1, %2 : vector<4x32xf32>
    %c0_3 = arith.constant 0 : index
    %c0_4 = arith.constant 0 : index
    %4 = vector.load %arg2[%c0_3, %c0_4] : memref<32x4xf32, #tpu.memory_space<vmem>>, vector<32x4xf32>
    %cst_5 = arith.constant dense<0.000000e+00> : vector<4x4xf32>
    %5 = tpu.matmul %3, %4, %cst_5 {dimension_numbers = #tpu.dot_dimension_numbers<[1], [0], [0], [1], [0, 0, 1, 1], [], []>} : vector<4x32xf32>, vector<32x4xf32>, vector<4x4xf32> -> vector<4x4xf32>
    %c0_6 = arith.constant 0 : index
    %c0_7 = arith.constant 0 : index
    %6 = vector.load %arg3[%c0_6, %c0_7] : memref<1x4xf32, #tpu.memory_space<vmem>>, vector<1x4xf32>
    %7 = vector.broadcast %6 : vector<1x4xf32> to vector<4x4xf32>
    %8 = arith.addf %5, %7 : vector<4x4xf32>
    %cst_8 = arith.constant 0.000000e+00 : f32
    %9 = vector.broadcast %cst_8 : f32 to vector<4x4xf32>
    %10 = arith.maximumf %8, %9 : vector<4x4xf32>
    %c0_9 = arith.constant 0 : index
    %c0_10 = arith.constant 0 : index
    %11 = vector.load %arg4[%c0_9, %c0_10] : memref<4x32xf32, #tpu.memory_space<vmem>>, vector<4x32xf32>
    %cst_11 = arith.constant dense<0.000000e+00> : vector<4x32xf32>
    %12 = tpu.matmul %10, %11, %cst_11 {dimension_numbers = #tpu.dot_dimension_numbers<[1], [0], [0], [1], [0, 0, 1, 1], [], []>} : vector<4x4xf32>, vector<4x32xf32>, vector<4x32xf32> -> vector<4x32xf32>
    %c0_12 = arith.constant 0 : index
    %c0_13 = arith.constant 0 : index
    %13 = vector.load %arg5[%c0_12, %c0_13] : memref<1x32xf32, #tpu.memory_space<vmem>>, vector<1x32xf32>
    %14 = vector.broadcast %13 : vector<1x32xf32> to vector<4x32xf32>
    %15 = arith.addf %12, %14 : vector<4x32xf32>
    %16 = arith.negf %15 : vector<4x32xf32>
    %17 = math.exp %16 : vector<4x32xf32>
    %cst_14 = arith.constant 1.000000e+00 : f32
    %18 = vector.broadcast %cst_14 : f32 to vector<4x32xf32>
    %19 = arith.addf %18, %17 : vector<4x32xf32>
    %20 = arith.divf %18, %19 : vector<4x32xf32>
    %21 = vector.shape_cast %20 : vector<4x32xf32> to vector<4x32x1xf32>
    %22 = vector.broadcast %21 : vector<4x32x1xf32> to vector<4x32x256xf32>
    %23 = arith.mulf %0, %22 : vector<4x32x256xf32>
    %c0_15 = arith.constant 0 : index
    %c0_16 = arith.constant 0 : index
    %c0_17 = arith.constant 0 : index
    %24 = vector.load %arg6[%c0_15, %c0_16, %c0_17] : memref<4x32x256xf32, #tpu.memory_space<vmem>>, vector<4x32x256xf32>
    tpu.vector_store %arg6[%c0_15, %c0_16, %c0_17], %23 {strides = array<i32>} : memref<4x32x256xf32, #tpu.memory_space<vmem>>, vector<4x32x256xf32>,
    return
  }
  func.func @transform_0(%arg0: i32) -> (i32, i32, i32) {
    %c0_i32 = arith.constant 0 : i32
    %c0_i32_0 = arith.constant 0 : i32
    %c0_i32_1 = arith.constant 0 : i32
    return %arg0, %c0_i32, %c0_i32_0 : i32, i32, i32
  }
  func.func @transform_1(%arg0: i32) -> (i32, i32) {
    %c0_i32 = arith.constant 0 : i32
    %c0_i32_0 = arith.constant 0 : i32
    %c0_i32_1 = arith.constant 0 : i32
    return %c0_i32, %c0_i32_0 : i32, i32
  }
  func.func @transform_2(%arg0: i32) -> (i32, i32) {
    %c0_i32 = arith.constant 0 : i32
    %c0_i32_0 = arith.constant 0 : i32
    %c0_i32_1 = arith.constant 0 : i32
    return %c0_i32, %c0_i32_0 : i32, i32
  }
  func.func @transform_3(%arg0: i32) -> (i32, i32) {
    %c0_i32 = arith.constant 0 : i32
    %c0_i32_0 = arith.constant 0 : i32
    %c0_i32_1 = arith.constant 0 : i32
    return %c0_i32, %c0_i32_0 : i32, i32
  }
  func.func @transform_4(%arg0: i32) -> (i32, i32) {
    %c0_i32 = arith.constant 0 : i32
    %c0_i32_0 = arith.constant 0 : i32
    %c0_i32_1 = arith.constant 0 : i32
    return %c0_i32, %c0_i32_0 : i32, i32
  }
  func.func @transform_5(%arg0: i32) -> (i32, i32, i32) {
    %c0_i32 = arith.constant 0 : i32
    %c0_i32_0 = arith.constant 0 : i32
    %c0_i32_1 = arith.constant 0 : i32
    return %arg0, %c0_i32, %c0_i32_0 : i32, i32, i32
  }
}

</mosaic_0001>

<bundles_post_ra>
// kernel: tpu_custom_call.1
= control target key start
LH: loop header
LB: loop body
LE: loop exit
PB: predicated region body
PF: predicated region fallthrough
CT: control target
= control target key end

     0   :  { %10 = vsyncpa [#allocation3], 0  ;;  %s1332_s0 = inlined_call_operand.hbm [shape: f32[8,32,256], index: 0, kind: input, shape index: {}]   ;;  %s1333_s1 = inlined_call_operand.vmem [shape: f32[32,4], index: 1, kind: input, shape index: {}]   ;;  %s1334_s2 = inlined_call_operand.vmem [shape: f32[1,4], index: 2, kind: input, shape index: {}]   ;;  %s1335_s3 = inlined_call_operand.vmem [shape: f32[4,32], index: 3, kind: input, shape index: {}]   ;;  %s1336_s4 = inlined_call_operand.vmem [shape: f32[1,32], index: 4, kind: input, shape index: {}]   ;;  %s1337_s5 = inlined_call_operand.hbm [shape: f32[8,32,256], index: 5, kind: output, shape index: {}]  }
   0x1   :  { %12 = vsyncpa [#allocation3 + $0x1], 0 }
   0x2   :  { %13 = vsyncpa [#allocation4], 0 }
   0x3   :  { %15 = vsyncpa [#allocation4 + $0x1], 0  ;;  %s968_s18 = smov 0   ;;  %s970_s19 = smov 0  }
   0x4   :  { %s972_s20 = smov 0   ;;  %s974_s21 = smov 0  }
   0x5 LB: > { %s989_s22 = sadd.s32 4294967295, %s932_s21   ;;  %s740_s23 = sadd.s32 4294967294, %s932_s21   ;;  %s932_s21 = sphi %s974_s21, %s1358_s21   ;;  %s928_s20 = sphi %s972_s20, %s1357_s20   ;;  %s924_s19 = sphi %s970_s19, %s1356_s19   ;;  %s920_s18 = sphi %s968_s18, %s1355_s18  }
   0x6   : > { %s993_s24 = sadd.s32 1, %s932_s21   ;;  %s28_s25 = sadd.s32 1, %s928_s20 }
   0x7   : > { %s25_s26 = ssub.s32 %s932_s21, %s993_s24  ;;  %p35_p0 = scmp.ne.s32.totalorder %s928_s20, %s924_s19 }
   0x8   : > { %p26_p1 = scmp.eq.s32.totalorder %s25_s26, 0  ;;  %p36_p2 = scmp.eq.s32.totalorder %s932_s21, 0 }
   0x9   : > { %p41_p3 = scmp.ne.s32.totalorder %s924_s19, %s920_s18  ;;  %p42_p4 = scmp.eq.s32.totalorder %s989_s22, 0 }
   0xa   : > { %s1005_s27 = scalar_select %p26_p1, %s928_s20, %s28_s25  }
   0xb   : > { %p1007_p5 = por %p36_p2, %p35_p0  ;;  %p1011_p6 = por %p42_p4, %p41_p3 }
   0xc   : > { %p149_p7 = scmp.eq.s32.totalorder %s989_s22, 1  ;;  %p155_p8 = scmp.eq.s32.totalorder %s740_s23, 1 }
   0xd   : > { %p776_p10 = scmp.lt.s32.totalorder %s932_s21, 2  ;;  %s187_s7 = sand.u32 1, %s928_s20  }
   0xe   : > { %p1018_p11 = por %p149_p7, %p35_p0  ;;  %p1022_p12 = por %p155_p8, %p41_p3 }
   0xf   : > { %s761_s8 = sshll.u32 %s932_s21, 8  ;;  %s743_s9 = sshll.u32 %s187_s7, 8 }
  0x10   : > { %s197_s12 = scalar_lea.hbm %s1332_s0, %s761_s8  ;;  %s191_s14 = scalar_lea.vmem [#allocation2], %s743_s9 }
  0x11   : > { %s198_s13 = sshll.u32 %s197_s12, 4  ;;  %s200_s15 = sshll.u32 %s191_s14, 4  ;;  %s199_s13 = int_to_ptr.hbm [resolvable:$true] %s198_s13  ;;  %s201_s15 = int_to_ptr.vmem [resolvable:$true] %s200_s15 }
  0x12   : > { %p1033_p13 = pnand %p776_p10, %p1007_p5  ;;  %p747_p0 = scmp.ge.s32.totalorder %s932_s21, 1 }
  0x13   : > { %p208_p1 = scmp.lt.s32.totalorder %s932_s21, 3  ;;  %s188_s17 = scalar_lea.sflag [#allocation3], %s187_s7 }
  0x14   : > { %s836_s23 = sshra.s32 %s199_s13, 4  ;;  %p840_p3 = pneg %p1033_p13  ;;  %s837_s23 = int_to_ptr.hbm [resolvable:$true] %s836_s23 }
  0x15   : > { %s838_s25 = scalar_lea.hbm %s837_s23, 256  ;;  %s843_s28 = scalar_lea.hbm %s1332_s0, 512 }
  0x16   : > { %p839_p2 = scmp.ne.s32.totalorder %s837_s23, %s838_s25  ;;  %p844_p5 = scmp.lt.s32.totalorder %s837_s23, %s1332_s0 }
  0x17   : > { %p845_p8 = scmp.lt.s32.totalorder %s843_s28, %s838_s25 }
  0x18   : > { %p841_p4 = pnand %p840_p3, %p839_p2 }
  0x19   : > { %p846_p10 = por %p845_p8, %p844_p5 }
  0x1a   : > { %p842_p7 = pneg %p841_p4 }
  0x1c   : > { %p847_p9 = pnand %p846_p10, %p842_p7 }
  0x1e   : > { %850 = shalt.err (!%p847_p9)
}
  0x1f   : > { %s934_s7 = smov 256   ;;  %s935_s11 = smov 16  }
  0x20   : > { %771 = dma.hbm_to_vmem [thread:$0]  (!%p1033_p13), %s199_s13, 4096, %s201_s15, %s188_s17, %s934_s7, %s934_s7, %s935_s11  }
  0x21   : > { %p209_p2 = pnand %p747_p0, %p208_p1 }
  0x23   : > { %212 = sbr.rel (%p209_p2) target bundleno = 695 (0x2b7), region = 40 }
  0x28   : > { %s1054_s12 = sand.u32 1, %s924_s19  }
  0x29   : > { %s748_s14 = sshll.u32 %s1054_s12, 8  ;;  %s215_s23 = scalar_lea.sflag [#allocation3], %s1054_s12 }
  0x2a   : > { %s1060_s25 = scalar_lea.vmem [#allocation2], %s748_s14 }
  0x2b   : > { %911 = dma.done.wait (%p1011_p6), %s215_s23, 4096  }
  0x2c   : > { %913 = vsyncadd (%p1011_p6), %s215_s23, 4294963200  ;;  %v1067_v0 = vld [vmem:[%s1060_s25 + $0x40] sm:$0xff]  ;;  %v1070_v1 = vld [vmem:[%s1060_s25 + $0x48] sm:$0xff]  ;;  %v1338_v61 = vlaneseq  ;;  %vm373_vm0 = vcmask 130112   ;;  %vm377_vm1 = vcmask 195712   ;;  %vm381_vm2 = vcmask 261312  }
  0x2d   : > { %v1073_v2 = vld [vmem:[%s1060_s25 + $0x20] sm:$0xff]  ;;  %v292_v3 = vadd.f32 %v1070_v1, %v1067_v0  ;;  %v1078_v4 = vld [vmem:[%s1060_s25 + $0x28] sm:$0xff]  ;;  %v1091_v9 = vld [vmem:[%s1060_s25 + $0x50] sm:$0xff]  ;;  %vm404_vm3 = vcmask 1041409   ;;  %vm406_vm4 = vcmask 1042434   ;;  %vm408_vm5 = vcmask 1043459  }
  0x2e   : > { %v1081_v5 = vld [vmem:[%s1060_s25] sm:$0xff]  ;;  %v1084_v6 = vld [vmem:[%s1060_s25 + $0x8] sm:$0xff]  ;;  %v286_v7 = vadd.f32 %v1078_v4, %v1073_v2  ;;  %v1094_v10 = vld [vmem:[%s1060_s25 + $0x58] sm:$0xff]  ;;  %vm410_vm6 = vcmask 261120   ;;  %vm443_vm7 = vcmask 1043456   ;;  %vm439_vm8 = vcmask 31744  }
  0x2f   : > { %v280_v8 = vadd.f32 %v1084_v6, %v1081_v5  ;;  %293 = vadd.xlane.f32.xlu1 %v292_v3  ;;  %v1097_v11 = vld [vmem:[%s1060_s25 + $0x60] sm:$0xff]  ;;  %v1100_v12 = vld [vmem:[%s1060_s25 + $0x68] sm:$0xff]  ;;  %v1103_v13 = vld [vmem:[%s1060_s25 + $0x10] sm:$0xff]  ;;  %v295_v15 = vadd.f32 %v1094_v10, %v1091_v9  ;;  %s1234_s29 = scalar_lea.vmem [#allocation5], %s748_s14  ;;  %s763_s14 = sshll.u32 %s989_s22, 8 }
  0x30   : > { %287 = vadd.xlane.f32.xlu2 %v286_v7  ;;  %v1106_v14 = vld [vmem:[%s1060_s25 + $0x18] sm:$0xff]  ;;  %v298_v16 = vadd.f32 %v1100_v12, %v1097_v11  ;;  %v1115_v18 = vld [vmem:[%s1060_s25 + $0x90] sm:$0xff]  ;;  %v1127_v22 = vld [vmem:[%s1060_s25 + $0x80] sm:$0xff]  ;;  %v369_v7 = vand.u32 127, %v1338_v61  ;;  %s663_s16 = scalar_lea.hbm %s1337_s5, %s763_s14  ;;  %s664_s17 = sshll.u32 %s1234_s29, 4  ;;  %s665_s17 = int_to_ptr.vmem [resolvable:$true] %s664_s17 }
  0x31   : > { %281 = vadd.xlane.f32.xlu0 %v280_v8  ;;  %v283_v17 = vadd.f32 %v1106_v14, %v1103_v13  ;;  %v1118_v19 = vld [vmem:[%s1060_s25 + $0x98] sm:$0xff]  ;;  %v1121_v20 = vld [vmem:[%s1060_s25 + $0x30] sm:$0xff]  ;;  %v1130_v23 = vld [vmem:[%s1060_s25 + $0x88] sm:$0xff]  ;;  %s666_s26 = sshll.u32 %s663_s16, 4  ;;  %s651_s22 = scalar_lea.sflag [#allocation4], %s1054_s12  ;;  %s667_s26 = int_to_ptr.hbm [resolvable:$true] %s666_s26 }
  0x32   : > { %v1124_v21 = vld [vmem:[%s1060_s25 + $0x38] sm:$0xff]  ;;  %v307_v24 = vadd.f32 %v1118_v19, %v1115_v18  ;;  %v304_v26 = vadd.f32 %v1130_v23, %v1127_v22  ;;  %v1139_v27 = vld [vmem:[%s1060_s25 + $0xa0] sm:$0xff]  ;;  %v1142_v28 = vld [vmem:[%s1060_s25 + $0xa8] sm:$0xff]  ;;  %s880_s8 = sshra.s32 %s667_s26, 4  ;;  %s886_s7 = scalar_lea.hbm %s1337_s5, 512  ;;  %s881_s8 = int_to_ptr.hbm [resolvable:$true] %s880_s8 }
  0x33   : > { %v289_v25 = vadd.f32 %v1124_v21, %v1121_v20  ;;  %v1145_v29 = vld [vmem:[%s1060_s25 + $0x70] sm:$0xff]  ;;  %v1148_v30 = vld [vmem:[%s1060_s25 + $0x78] sm:$0xff]  ;;  %v1151_v31 = vld [vmem:[%s1060_s25 + $0xc0] sm:$0xff]  ;;  %v310_v33 = vadd.f32 %v1142_v28, %v1139_v27  ;;  %s882_s28 = scalar_lea.hbm %s881_s8, 256  ;;  %p887_p0 = scmp.lt.s32.totalorder %s881_s8, %s1337_s5 }
  0x34   : > { %v1154_v32 = vld [vmem:[%s1060_s25 + $0xc8] sm:$0xff]  ;;  %v301_v34 = vadd.f32 %v1148_v30, %v1145_v29  ;;  %v1163_v36 = vld [vmem:[%s1060_s25 + $0xb0] sm:$0xff]  ;;  %v1166_v37 = vld [vmem:[%s1060_s25 + $0xb8] sm:$0xff]  ;;  %p883_p6 = scmp.ne.s32.totalorder %s881_s8, %s882_s28  ;;  %p888_p1 = scmp.lt.s32.totalorder %s886_s7, %s882_s28 }
  0x35   : > { %v316_v35 = vadd.f32 %v1154_v32, %v1151_v31  ;;  %v1169_v38 = vld [vmem:[%s1060_s25 + $0xd0] sm:$0xff]  ;;  %v1172_v39 = vld [vmem:[%s1060_s25 + $0xd8] sm:$0xff]  ;;  %v1175_v40 = vld [vmem:[%s1060_s25 + $0xe0] sm:$0xff]  ;;  %v313_v42 = vadd.f32 %v1166_v37, %v1163_v36 }
  0x36   : > { %1347 = vst [vmem:[#allocation8_spill] sm:$0xff] %v1169_v38  ;;  %v1178_v41 = vld [vmem:[%s1060_s25 + $0xe8] sm:$0xff]  ;;  %v319_v43 = vadd.f32 %v1172_v39, %v1169_v38  ;;  %v1187_v45 = vld [vmem:[%s1060_s25 + $0xf0] sm:$0xff]  ;;  %v1190_v46 = vld [vmem:[%s1060_s25 + $0xf8] sm:$0xff]  ;;  %p884_p9 = pnand %p883_p6, %p1018_p11  ;;  %p889_p3 = por %p888_p1, %p887_p0 }
  0x37   : > { %296 = vadd.xlane.f32.xlu1 %v295_v15  ;;  %1348 = vst [vmem:[#allocation9_spill] sm:$0xff] %v1172_v39  ;;  %v322_v44 = vadd.f32 %v1178_v41, %v1175_v40  ;;  %v325_v47 = vadd.f32 %v1190_v46, %v1187_v45  ;;  %v347_v51 = vld [vmem:[%s1333_s1 + $0x18] sm:$0xff]  ;;  %v346_v55 = vld [vmem:[%s1333_s1 + $0x10] sm:$0xff]  ;;  %v345_v56 = vld [vmem:[%s1333_s1 + $0x8] sm:$0xff]  ;;  %v371_v15 = vadd.s32 4294967288, %v369_v7 }
  0x38   : > { %299 = vadd.xlane.f32.xlu2 %v298_v16  ;;  %1349 = vst [vmem:[#allocation10_spill] sm:$0xff] %v1190_v46  ;;  %425 = vmatpush.msra.mxu0 %v347_v51  ;;  %v344_v57 = vld [vmem:[%s1333_s1] sm:$0xff]  ;;  %p885_p13 = pneg %p884_p9 }
  0x39   : > { %284 = vadd.xlane.f32.xlu0 %v283_v17  ;;  %v375_v17 = vadd.s32 4294967280, %v369_v7 }
  0x3a   : > { %426 = vmatpush.msra.mxu0 %v346_v55  ;;  %p890_p4 = pnand %p889_p3, %p885_p13 }
  0x3c   : > { %427 = vmatpush.msra.mxu0 %v345_v56 }
  0x3e   : > { %428 = vmatpush.msra.mxu0 %v344_v57 }
  0x3f   : > { %308 = vadd.xlane.f32.xlu1 %v307_v24 }
  0x40   : > { %290 = vadd.xlane.f32.xlu2 %v289_v25 }
  0x41   : > { %305 = vadd.xlane.f32.xlu0 %v304_v26 }
  0x47   : > { %311 = vadd.xlane.f32.xlu1 %v310_v33 }
  0x48   : > { %317 = vadd.xlane.f32.xlu2 %v316_v35 }
  0x49   : > { %302 = vadd.xlane.f32.xlu0 %v301_v34 }
  0x4f   : > { %314 = vadd.xlane.f32.xlu1 %v313_v42 }
  0x50   : > { %323 = vadd.xlane.f32.xlu2 %v322_v44 }
  0x51   : > { %320 = vadd.xlane.f32.xlu0 %v319_v43 }
  0x59   : > { %326 = vadd.xlane.f32.xlu0 %v325_v47 }
  0xa2   : > { %v294_v48 = vpop.xlane.xlu1 %293 }
  0xa3   : > { %v288_v49 = vpop.xlane.xlu2 %287  ;;  %v332_v8 = vmul.f32 0.00390625, %v294_v48  ;;  %v379_v48 = vadd.s32 4294967272, %v369_v7 }
  0xa4   : > { %v282_v50 = vpop.xlane.xlu0 %281  ;;  %v330_v61 = vmul.f32 0.00390625, %v288_v49 }
  0xa5   : > { %v328_v24 = vmul.f32 0.00390625, %v282_v50  ;;  %v383_v34 = vperm.slane %v332_v8, %v369_v7 }
  0xa7   : > { %v370_v39 = vperm.slane %v328_v24, %v369_v7 }
  0xaa   : > { %v297_v52 = vpop.xlane.xlu1 %296 }
  0xab   : > { %v300_v53 = vpop.xlane.xlu2 %299  ;;  %v333_v16 = vmul.f32 0.00390625, %v297_v52 }
  0xac   : > { %v285_v54 = vpop.xlane.xlu0 %284  ;;  %v334_v25 = vmul.f32 0.00390625, %v300_v53 }
  0xad   : > { %v329_v26 = vmul.f32 0.00390625, %v285_v54  ;;  %v384_v35 = vperm.slane %v333_v16, %v371_v15 }
  0xae   : > { %v386_v50 = vperm.slane %v334_v25, %v375_v17 }
  0xaf   : > { %v372_v38 = vperm.slane %v329_v26, %v371_v15  ;;  %v385_v54 = vsel %vm373_vm0, %v384_v35, %v383_v34 }
  0xb0   : > { %v387_v24 = vsel %vm377_vm1, %v386_v50, %v385_v54  ;;  %v1350_v50 = vlaneseq }
  0xb2   : > { %v309_v58 = vpop.xlane.xlu1 %308 }
  0xb3   : > { %v291_v59 = vpop.xlane.xlu2 %290  ;;  %v337_v42 = vmul.f32 0.00390625, %v309_v58 }
  0xb4   : > { %v306_v60 = vpop.xlane.xlu0 %305  ;;  %v331_v53 = vmul.f32 0.00390625, %v291_v59 }
  0xb5   : > { %v336_v43 = vmul.f32 0.00390625, %v306_v60  ;;  %v391_v8 = vperm.slane %v337_v42, %v371_v15 }
  0xb6   : > { %v380_v49 = vperm.slane %v331_v53, %v379_v48  ;;  %v488_v53 = vshrl.u32 %v1350_v50, 7 }
  0xb7   : > { %v390_v16 = vperm.slane %v336_v43, %v369_v7 }
  0xb8   : > { %814 = vset.pattern.permute.xlu1 %v488_v53  ;;  %v501_v54 = vadd.s32 16, %v488_v53 }
  0xb9   : > { %v392_v59 = vsel %vm373_vm0, %v391_v8, %v390_v16  ;;  %v495_v8 = vadd.s32 8, %v488_v53  ;;  %v831_v16 = vld [vmem:[%s1336_s4] ss:$0 sm:$0xff] }
  0xba   : > { %v312_v62 = vpop.xlane.xlu1 %311  ;;  %816 = vset.pattern.permute.xlu0 %v501_v54 }
  0xbb   : > { %v318_v3 = vpop.xlane.xlu2 %317  ;;  %v338_v47 = vmul.f32 0.00390625, %v312_v62  ;;  %815 = vset.pattern.permute.xlu2 %v495_v8 }
  0xbc   : > { %v303_v63 = vpop.xlane.xlu0 %302  ;;  %v340_v55 = vmul.f32 0.00390625, %v318_v3 }
  0xbd   : > { %v335_v51 = vmul.f32 0.00390625, %v303_v63  ;;  %v393_v60 = vperm.slane %v338_v47, %v375_v17 }
  0xbe   : > { %v397_v62 = vperm.slane %v340_v55, %v369_v7  ;;  %v434_v55 = vld [vmem:[%s1335_s3] sm:$0xf] }
  0xbf   : > { %v388_v46 = vperm.slane %v335_v51, %v379_v48  ;;  %v394_v34 = vsel %vm377_vm1, %v393_v60, %v392_v59  ;;  %751 = vmatpush.msk.msra.mxu1 %vm443_vm7, %v434_v55 }
  0xc1   : > { %v389_v35 = vsel %vm381_vm2, %v388_v46, %v387_v24 }
  0xc2   : > { %v315_v33 = vpop.xlane.xlu1 %314 }
  0xc3   : > { %v324_v57 = vpop.xlane.xlu2 %323  ;;  %v339_v52 = vmul.f32 0.00390625, %v315_v33  ;;  %v376_v33 = vperm.slane %v330_v61, %v375_v17 }
  0xc4   : > { %v321_v44 = vpop.xlane.xlu0 %320  ;;  %v342_v58 = vmul.f32 0.00390625, %v324_v57 }
  0xc5   : > { %v341_v56 = vmul.f32 0.00390625, %v321_v44  ;;  %v395_v3 = vperm.slane %v339_v52, %v379_v48  ;;  %v374_v44 = vsel %vm373_vm0, %v372_v38, %v370_v39 }
  0xc6   : > { %v400_v25 = vperm.slane %v342_v58, %v375_v17  ;;  %v378_v42 = vsel %vm377_vm1, %v376_v33, %v374_v44 }
  0xc7   : > { %v398_v63 = vperm.slane %v341_v56, %v371_v15  ;;  %v396_v38 = vsel %vm381_vm2, %v395_v3, %v394_v34  ;;  %v382_v39 = vsel %vm381_vm2, %v380_v49, %v378_v42  ;;  %v830_v56 = vld [vmem:[%s1334_s2] ss:$0 sm:$0xff]  ;;  %v507_v42 = vadd.s32 24, %v488_v53 }
  0xc8   : > { %v405_v17 = vsel %vm404_vm3, %v389_v35, %v382_v39 }
  0xc9   : > { %v399_v7 = vsel %vm373_vm0, %v398_v63, %v397_v62  ;;  %v407_v46 = vsel %vm406_vm4, %v396_v38, %v405_v17 }
  0xca   : > { %v401_v43 = vsel %vm377_vm1, %v400_v25, %v399_v7 }
  0xcc   : > { %v327_v26 = vpop.xlane.xlu0 %326 }
  0xcd   : > { %v343_v15 = vmul.f32 0.00390625, %v327_v26 }
  0xcf   : > { %v402_v61 = vperm.slane %v343_v15, %v379_v48 }
  0xd1   : > { %v403_v47 = vsel %vm381_vm2, %v402_v61, %v401_v43 }
  0xd2   : > { %v409_v51 = vsel %vm408_vm5, %v403_v47, %v407_v46 }
  0xd3   : > { %750 = vmatmul.msk.f32.vlgmr.msra.gmra.mxu0 %vm410_vm6, %v409_v51 }
 0x150   : > { %v430_v57 = vpop.f32.mrf.mxu0 }
 0x151   : > { %v431_v48 = vadd.f32 %v830_v56, %v430_v57 }
 0x153   : > { %v433_v52 = vmax.f32 %v431_v48, 0.0 }
 0x155   : > { %752 = vmatmul.msk.f32.vlgmr.msra.gmra.mxu1 %vm439_vm8, %v433_v52 }
 0x1d2   : > { %v464_v58 = vpop.f32.mrf.mxu1 }
 0x1d3   : > { %v465_v60 = vadd.f32 %v831_v16, %v464_v58 }
 0x1d5   : > { %v753_v62 = vmul.f32 -1.442695, %v465_v60 }
 0x1d7   : > { %832 = vpow2.f32 %v753_v62 }
 0x1dd   : > { %v833_v63 = vpop.eup %832 }
 0x1de   : > { %v470_v3 = vadd.f32 1.0, %v833_v63 }
 0x1e0   : > { %834 = vrcp.f32 %v470_v3  ;;  %v482_v24 = vand.u32 2147483648, %v470_v3  ;;  %v480_v25 = vand.u32 2147483647, %v470_v3  ;;  %vm476_vm10 = vweird.f32 %v470_v3 }
 0x1e2   : > { %v483_v34 = vor.u32 1.1754944e-38, %v482_v24  ;;  %vm481_vm12 = vcmp.eq.f32.partialorder %v480_v25, 8.507059e+37 }
 0x1e6   : > { %v835_v44 = vpop.eup %834 }
 0x1e7   : > { %v472_v49 = vmul.f32 %v835_v44, %v470_v3  ;;  %vm477_vm9 = vweird.f32 %v835_v44 }
 0x1e8   : > { %vm478_vm11 = vmor %vm476_vm10, %vm477_vm9 }
 0x1e9   : > { %v473_v33 = vsub.f32 1.0, %v472_v49  ;;  %v1353_v49 = vld [vmem:[#allocation9_spill] sm:$0xff] }
 0x1eb   : > { %v474_v59 = vmul.f32 %v835_v44, %v473_v33 }
 0x1ed   : > { %v475_v26 = vadd.f32 %v835_v44, %v474_v59 }
 0x1ef   : > { %v479_v35 = vsel %vm478_vm11, %v835_v44, %v475_v26 }
 0x1f0   : > { %v484_v7 = vsel %vm481_vm12, %v483_v34, %v479_v35 }
 0x1f1   : > { %v486_v15 = vperm.slane %v484_v7, 0  ;;  %v511_v38 = vperm.slane %v484_v7, 1  ;;  %v536_v39 = vperm.slane %v484_v7, 2  ;;  %v561_v61 = vperm.slane %v484_v7, 3 }
 0x1f3   : > { %503 = vperm.xlu0 %816, %v486_v15   ;;  %497 = vperm.xlu2 %815, %v486_v15  }
 0x1f4   : > { %491 = vperm.xlu1 %814, %v486_v15  }
 0x1fb   : > { %822 = vset.pattern.permute.xlu0 %v495_v8  ;;  %817 = vset.pattern.permute.xlu2 %v507_v42 }
 0x1fc   : > { %516 = vperm.xlu1 %814, %v511_v38  }
 0x203   : > { %547 = vperm.xlu0 %822, %v536_v39   ;;  %509 = vperm.xlu2 %817, %v486_v15  }
 0x204   : > { %819 = vset.pattern.permute.xlu1 %v501_v54 }
 0x20b   : > { %827 = vset.pattern.permute.xlu0 %v501_v54  ;;  %818 = vset.pattern.permute.xlu2 %v495_v8 }
 0x20c   : > { %528 = vperm.xlu1 %819, %v511_v38  }
 0x213   : > { %578 = vperm.xlu0 %827, %v561_v61   ;;  %522 = vperm.xlu2 %818, %v511_v38  }
 0x214   : > { %821 = vset.pattern.permute.xlu1 %v488_v53 }
 0x21b   : > { %820 = vset.pattern.permute.xlu2 %v507_v42  ;;  %829 = vset.pattern.permute.xlu0 %v507_v42 }
 0x21c   : > { %541 = vperm.xlu1 %821, %v536_v39  }
 0x223   : > { %534 = vperm.xlu2 %820, %v511_v38  }
 0x224   : > { %824 = vset.pattern.permute.xlu1 %v507_v42 }
 0x22b   : > { %823 = vset.pattern.permute.xlu2 %v501_v54 }
 0x22c   : > { %559 = vperm.xlu1 %824, %v536_v39  }
 0x233   : > { %553 = vperm.xlu2 %823, %v536_v39  }
 0x234   : > { %826 = vset.pattern.permute.xlu1 %v495_v8 }
 0x23b   : > { %825 = vset.pattern.permute.xlu2 %v488_v53 }
 0x23c   : > { %572 = vperm.xlu1 %826, %v561_v61  }
 0x243   : > { %566 = vperm.xlu2 %825, %v561_v61  }
 0x24b   : > { %828 = vset.pattern.permute.xlu2 %v507_v42 }
 0x24d   : > { %v498_v43 = vpop.permute.xlu2 %497 }
 0x24e   : > { %v588_v17 = vmul.f32 %v498_v43, %v1103_v13  ;;  %v589_v47 = vmul.f32 %v498_v43, %v1106_v14 }
 0x250   : > { %620 = vst [vmem:[%s1234_s29 + $0x10] sm:$0xff] %v588_v17 }
 0x251   : > { %621 = vst [vmem:[%s1234_s29 + $0x18] sm:$0xff] %v589_v47 }
 0x253   : > { %584 = vperm.xlu2 %828, %v561_v61  }
 0x25d   : > { %v510_v46 = vpop.permute.xlu2 %509 }
 0x25e   : > { %v592_v51 = vmul.f32 %v510_v46, %v1121_v20  ;;  %v593_v13 = vmul.f32 %v510_v46, %v1124_v21 }
 0x260   : > { %624 = vst [vmem:[%s1234_s29 + $0x30] sm:$0xff] %v592_v51 }
 0x261   : > { %625 = vst [vmem:[%s1234_s29 + $0x38] sm:$0xff] %v593_v13 }
 0x265   : > { %v504_v14 = vpop.permute.xlu0 %503 }
 0x266   : > { %v590_v55 = vmul.f32 %v504_v14, %v1073_v2  ;;  %v591_v56 = vmul.f32 %v504_v14, %v1078_v4  ;;  %v492_v57 = vpop.permute.xlu1 %491 }
 0x267   : > { %v586_v48 = vmul.f32 %v492_v57, %v1081_v5  ;;  %v587_v52 = vmul.f32 %v492_v57, %v1084_v6 }
 0x268   : > { %622 = vst [vmem:[%s1234_s29 + $0x20] sm:$0xff] %v590_v55 }
 0x269   : > { %623 = vst [vmem:[%s1234_s29 + $0x28] sm:$0xff] %v591_v56 }
 0x26a   : > { %618 = vst [vmem:[%s1234_s29] sm:$0xff] %v586_v48 }
 0x26b   : > { %619 = vst [vmem:[%s1234_s29 + $0x8] sm:$0xff] %v587_v52 }
 0x26d   : > { %v523_v20 = vpop.permute.xlu2 %522 }
 0x26e   : > { %v596_v21 = vmul.f32 %v523_v20, %v1091_v9  ;;  %v597_v2 = vmul.f32 %v523_v20, %v1094_v10  ;;  %v517_v50 = vpop.permute.xlu1 %516 }
 0x26f   : > { %v594_v4 = vmul.f32 %v517_v50, %v1067_v0  ;;  %v595_v53 = vmul.f32 %v517_v50, %v1070_v1 }
 0x270   : > { %628 = vst [vmem:[%s1234_s29 + $0x50] sm:$0xff] %v596_v21 }
 0x271   : > { %629 = vst [vmem:[%s1234_s29 + $0x58] sm:$0xff] %v597_v2 }
 0x272   : > { %626 = vst [vmem:[%s1234_s29 + $0x40] sm:$0xff] %v594_v4 }
 0x273   : > { %627 = vst [vmem:[%s1234_s29 + $0x48] sm:$0xff] %v595_v53 }
 0x275   : > { %v548_v5 = vpop.permute.xlu0 %547 }
 0x276   : > { %v604_v6 = vmul.f32 %v548_v5, %v1115_v18  ;;  %v605_v9 = vmul.f32 %v548_v5, %v1118_v19 }
 0x278   : > { %636 = vst [vmem:[%s1234_s29 + $0x90] sm:$0xff] %v604_v6 }
 0x279   : > { %637 = vst [vmem:[%s1234_s29 + $0x98] sm:$0xff] %v605_v9 }
 0x27d   : > { %v535_v0 = vpop.permute.xlu2 %534 }
 0x27e   : > { %v600_v1 = vmul.f32 %v535_v0, %v1145_v29  ;;  %v601_v10 = vmul.f32 %v535_v0, %v1148_v30  ;;  %v529_v54 = vpop.permute.xlu1 %528 }
 0x27f   : > { %v598_v8 = vmul.f32 %v529_v54, %v1097_v11  ;;  %v599_v16 = vmul.f32 %v529_v54, %v1100_v12 }
 0x280   : > { %632 = vst [vmem:[%s1234_s29 + $0x70] sm:$0xff] %v600_v1 }
 0x281   : > { %633 = vst [vmem:[%s1234_s29 + $0x78] sm:$0xff] %v601_v10 }
 0x282   : > { %630 = vst [vmem:[%s1234_s29 + $0x60] sm:$0xff] %v598_v8 }
 0x283   : > { %631 = vst [vmem:[%s1234_s29 + $0x68] sm:$0xff] %v599_v16 }
 0x285   : > { %v579_v18 = vpop.permute.xlu0 %578 }
 0x286   : > { %v614_v19 = vmul.f32 %v579_v18, %v1175_v40  ;;  %v615_v29 = vmul.f32 %v579_v18, %v1178_v41 }
 0x288   : > { %646 = vst [vmem:[%s1234_s29 + $0xe0] sm:$0xff] %v614_v19 }
 0x289   : > { %647 = vst [vmem:[%s1234_s29 + $0xe8] sm:$0xff] %v615_v29 }
 0x28d   : > { %v554_v30 = vpop.permute.xlu2 %553 }
 0x28e   : > { %v606_v11 = vmul.f32 %v554_v30, %v1139_v27  ;;  %v607_v12 = vmul.f32 %v554_v30, %v1142_v28  ;;  %v542_v58 = vpop.permute.xlu1 %541 }
 0x28f   : > { %v602_v60 = vmul.f32 %v542_v58, %v1127_v22  ;;  %v603_v62 = vmul.f32 %v542_v58, %v1130_v23 }
 0x290   : > { %638 = vst [vmem:[%s1234_s29 + $0xa0] sm:$0xff] %v606_v11 }
 0x291   : > { %639 = vst [vmem:[%s1234_s29 + $0xa8] sm:$0xff] %v607_v12 }
 0x292   : > { %634 = vst [vmem:[%s1234_s29 + $0x80] sm:$0xff] %v602_v60 }
 0x293   : > { %635 = vst [vmem:[%s1234_s29 + $0x88] sm:$0xff] %v603_v62 }
 0x29d   : > { %v567_v40 = vpop.permute.xlu2 %566 }
 0x29e   : > { %v610_v41 = vmul.f32 %v567_v40, %v1151_v31  ;;  %v611_v27 = vmul.f32 %v567_v40, %v1154_v32  ;;  %v560_v63 = vpop.permute.xlu1 %559  ;;  %v1351_v31 = vld [vmem:[#allocation10_spill] sm:$0xff] }
 0x29f   : > { %v608_v28 = vmul.f32 %v560_v63, %v1163_v36  ;;  %v609_v3 = vmul.f32 %v560_v63, %v1166_v37  ;;  %v1352_v37 = vld [vmem:[#allocation8_spill] sm:$0xff] }
 0x2a0   : > { %642 = vst [vmem:[%s1234_s29 + $0xc0] sm:$0xff] %v610_v41 }
 0x2a1   : > { %643 = vst [vmem:[%s1234_s29 + $0xc8] sm:$0xff] %v611_v27 }
 0x2a2   : > { %640 = vst [vmem:[%s1234_s29 + $0xb0] sm:$0xff] %v608_v28 }
 0x2a3   : > { %641 = vst [vmem:[%s1234_s29 + $0xb8] sm:$0xff] %v609_v3 }
 0x2ad   : > { %v585_v22 = vpop.permute.xlu2 %584 }
 0x2ae   : > { %v616_v23 = vmul.f32 %v585_v22, %v1187_v45  ;;  %v617_v32 = vmul.f32 %v585_v22, %v1351_v31  ;;  %v573_v36 = vpop.permute.xlu1 %572 }
 0x2af   : > { %v612_v44 = vmul.f32 %v573_v36, %v1352_v37  ;;  %v613_v33 = vmul.f32 %v573_v36, %v1353_v49 }
 0x2b0   : > { %648 = vst [vmem:[%s1234_s29 + $0xf0] sm:$0xff] %v616_v23 }
 0x2b1   : > { %649 = vst [vmem:[%s1234_s29 + $0xf8] sm:$0xff] %v617_v32 }
 0x2b2   : > { %644 = vst [vmem:[%s1234_s29 + $0xd0] sm:$0xff] %v612_v44 }
 0x2b3   : > { %645 = vst [vmem:[%s1234_s29 + $0xd8] sm:$0xff] %v613_v33 }
 0x2b4   : > { %893 = shalt.err (!%p890_p4)
}
 0x2b5   : > { %s936_s12 = smov 256   ;;  %s937_s25 = smov 16  }
 0x2b6   : > { %766 = dma.vmem_to_hbm [thread:$0]  (%p1018_p11), %s665_s17, 4096, %s667_s26, %s651_s22, %s936_s12, %s936_s12, %s937_s25  }
 0x2b7 PF: > { %s681_s29 = sand.u32 1, %s920_s18   ;;  %p1354_p7 = scmp.ge.s32.totalorder %s932_s21, 2 }
 0x2b8   : > { %s682_s14 = scalar_lea.sflag [#allocation4], %s681_s29 }
 0x2b9   : > { %p773_p5 = pnand %p1354_p7, %p1022_p12 }
 0x2bb   : > { %p774_p8 = pneg %p773_p5 }
 0x2bd   : > { %915 = dma.done.wait (%p774_p8), %s682_s14, 4096  }
 0x2be   : > { %917 = vsyncadd (%p774_p8), %s682_s14, 4294963200  ;;  %p18_p10 = scmp.ge.s32.totalorder %s993_s24, 4   ;;  %s1355_s18 = smov %s924_s19 }
 0x2bf   : > { %s1356_s19 = smov %s928_s20  ;;  %s1357_s20 = smov %s1005_s27 }
 0x2c0   : > { %s1358_s21 = smov %s993_s24  ;;  %20 = sbr.rel (!%p18_p10) target bundleno = 5 (0x5), region = 85 }
 0x2c5   :  { %688 = vsyncpa [#allocation3], 1 }
 0x2c6   :  { %690 = vsyncpa [#allocation3 + $0x1], 1 }
 0x2c7   :  { %691 = vsyncpa [#allocation4], 1 }
 0x2c8   :  { %693 = vsyncpa [#allocation4 + $0x1], 1 }

</bundles_post_ra>
